<compile_context>
chip_gen: v7x
topology: tpu7x:2x2x1
jax: 0.10.0
libtpu: 0.0.40
codegen_flags: <defaults>
</compile_context>

<pallas_src>
import functools

import jax
import jax.numpy as jnp
from jax import lax
from jax.experimental import pallas as pl
from jax.experimental.pallas import tpu as pltpu

_LANES = 128     # vreg lane width
_SUBLANES = 8    # f32 sublane count


def _round_up(a: int, b: int) -> int:
    return ((a + b - 1) // b) * b


def _cdiv(a: int, b: int) -> int:
    return (a + b - 1) // b


def _phase_amp_relu_kernel(x_ref, o_ref):
    """x_ref/o_ref: (2, tm, 128) f32 — plane 0 = real, plane 1 = imag."""
    re = x_ref[0]
    im = x_ref[1]
    r = jnp.sqrt(re * re + im * im)              # relu(|x|) == |x|
    # angle(x) = atan2(im, re) > 0  <=>  im > 0  or  (im == 0 and re < 0).
    keep = (im > 0.0) | ((im == 0.0) & (re < 0.0))
    # keep:   relu(angle) == angle -> output x unchanged
    # ~keep:  relu(angle) == 0     -> output |x| + 0j
    o_ref[0] = jnp.where(keep, re, r)
    o_ref[1] = jnp.where(keep, im, jnp.zeros_like(im))


def _choose_tile(rows: int, block_rows: int) -> int:
    """Pick tm (multiple of 8) so the grid has >= ~4 steps when possible."""
    steps = max(4, _cdiv(rows, block_rows))
    tm = _round_up(_cdiv(rows, steps), _SUBLANES)
    return max(_SUBLANES, min(block_rows, tm))


def _launch(stacked: jax.Array, tm: int) -> jax.Array:
    """Run the kernel on a (2, rows, 128) float32 slab."""
    rows = stacked.shape[1]
    grid = (_cdiv(rows, tm),)                      # ragged last block is fine
    block_bytes = 2 * tm * _LANES * 4              # one stacked (2,tm,128) tile
    # in + out, double-buffered, plus a small margin; capped for v7x (64 MiB).
    vmem_limit = min(4 * block_bytes + (4 << 20), 48 << 20)
    return pl.pallas_call(
        _phase_amp_relu_kernel,
        out_shape=jax.ShapeDtypeStruct((2, rows, _LANES), jnp.float32),
        grid_spec=pltpu.PrefetchScalarGridSpec(
            num_scalar_prefetch=0,
            grid=grid,
            in_specs=[pl.BlockSpec((2, tm, _LANES), lambda i: (0, i, 0))],
            out_specs=pl.BlockSpec((2, tm, _LANES), lambda i: (0, i, 0)),
        ),
        compiler_params=pltpu.CompilerParams(
            dimension_semantics=("parallel",),
            vmem_limit_bytes=vmem_limit,
        ),
    )(stacked)


@functools.partial(jax.jit, static_argnames=("block_rows",))
def phase_amplitude_relu_planes(re: jax.Array, im: jax.Array,
                                block_rows: int = 4096):
    """Split-plane entry point: takes/returns float32 (re, im) planes.

    Use this when adjacent ops already keep complex data in split form — it
    avoids the complex64 split/recombine HBM passes of the complex wrapper.
    """
    orig_shape = re.shape
    n = re.size

    rows = _round_up(max(1, _cdiv(n, _LANES)), _SUBLANES)   # sublane pad only
    padded = rows * _LANES

    re_f = re.astype(jnp.float32).reshape(-1)
    im_f = im.astype(jnp.float32).reshape(-1)
    if padded != n:
        re_f = jnp.pad(re_f, (0, padded - n))
        im_f = jnp.pad(im_f, (0, padded - n))
    # Single stacked slab: one DMA stream in, one out (fused with the reshape
    # / pad into one XLA pass under jit).
    stacked = jnp.stack([re_f.reshape(rows, _LANES),
                         im_f.reshape(rows, _LANES)])

    tm = _choose_tile(rows, block_rows)
    out = _launch(stacked, tm)

    out_re = out[0].reshape(-1)[:n].reshape(orig_shape)
    out_im = out[1].reshape(-1)[:n].reshape(orig_shape)
    return out_re, out_im


@functools.partial(jax.jit, static_argnames=("block_rows",))
def phase_amplitude_relu(x: jax.Array, block_rows: int = 4096) -> jax.Array:
    """PhaseAmplitudeReLU: relu(|x|) * exp(1j * relu(angle(x))) for complex64 x."""
    out_re, out_im = phase_amplitude_relu_planes(
        jnp.real(x), jnp.imag(x), block_rows=block_rows)
    return lax.complex(out_re, out_im)


def _reference(x: jax.Array) -> jax.Array:
    # Faithful to the PyTorch module: relu(|x|) * exp(1j * relu(angle(x))).
    amp = jax.nn.relu(jnp.abs(x))
    ang = jax.nn.relu(jnp.angle(x))
    return amp * jnp.exp(1j * ang)


if __name__ == "__main__":
    key = jax.random.PRNGKey(0)
    k_re, k_im = jax.random.split(key)
    shape = (2, 4, 16, 16)  # small NCHW-style complex input
    x_re = jax.random.normal(k_re, shape, dtype=jnp.float32)
    x_im = jax.random.normal(k_im, shape, dtype=jnp.float32)
    x = lax.complex(x_re, x_im)  # complex64

    out = jax.block_until_ready(phase_amplitude_relu(x))

    ref = _reference(x)
    assert out.shape == shape and out.dtype == jnp.complex64
    assert jnp.allclose(out, ref, atol=1e-5, rtol=1e-5), float(
        jnp.max(jnp.abs(out - ref)))

    # Split-plane path must agree with the complex path.
    o_re, o_im = phase_amplitude_relu_planes(x_re, x_im)
    o_re, o_im = jax.block_until_ready((o_re, o_im))
    assert jnp.allclose(lax.complex(o_re, o_im), ref, atol=1e-5, rtol=1e-5)

    print("KERNEL_OK")
</pallas_src>

<mosaic_0001>
module attributes {stable_mosaic.version = 11 : i64} {
  func.func @_phase_amp_relu_kernel(%arg0: i32, %arg1: memref<2x8x128xf32, #tpu.memory_space<vmem>>, %arg2: memref<2x8x128xf32, #tpu.memory_space<vmem>>) attributes {dimension_semantics = [#tpu.dimension_semantics<parallel>], iteration_bounds = array<i64: 2>, scalar_prefetch = 0 : i64, scratch_operands = 0 : i64, tpu.core_type = #tpu.core_type<tc>, window_params = [{transform_indices = @transform_0, window_bounds = array<i64: 2, 8, 128>}, {transform_indices = @transform_1, window_bounds = array<i64: 2, 8, 128>}]} {
    %c0 = arith.constant 0 : index
    %c0_0 = arith.constant 0 : index
    %c0_1 = arith.constant 0 : index
    %0 = vector.load %arg1[%c0, %c0_0, %c0_1] : memref<2x8x128xf32, #tpu.memory_space<vmem>>, vector<1x8x128xf32>
    %1 = vector.shape_cast %0 : vector<1x8x128xf32> to vector<8x128xf32>
    %c1 = arith.constant 1 : index
    %c0_2 = arith.constant 0 : index
    %c0_3 = arith.constant 0 : index
    %2 = vector.load %arg1[%c1, %c0_2, %c0_3] : memref<2x8x128xf32, #tpu.memory_space<vmem>>, vector<1x8x128xf32>
    %3 = vector.shape_cast %2 : vector<1x8x128xf32> to vector<8x128xf32>
    %4 = arith.mulf %1, %1 : vector<8x128xf32>
    %5 = arith.mulf %3, %3 : vector<8x128xf32>
    %6 = arith.addf %4, %5 : vector<8x128xf32>
    %7 = math.sqrt %6 : vector<8x128xf32>
    %cst = arith.constant 0.000000e+00 : f32
    %8 = vector.broadcast %cst : f32 to vector<8x128xf32>
    %9 = arith.cmpf ogt, %3, %8 : vector<8x128xf32>
    %cst_4 = arith.constant 0.000000e+00 : f32
    %10 = vector.broadcast %cst_4 : f32 to vector<8x128xf32>
    %11 = arith.cmpf oeq, %3, %10 : vector<8x128xf32>
    %cst_5 = arith.constant 0.000000e+00 : f32
    %12 = vector.broadcast %cst_5 : f32 to vector<8x128xf32>
    %13 = arith.cmpf olt, %1, %12 : vector<8x128xf32>
    %14 = arith.andi %11, %13 : vector<8x128xi1>
    %15 = arith.ori %9, %14 : vector<8x128xi1>
    %16 = arith.select %15, %1, %7 : vector<8x128xi1>, vector<8x128xf32>
    %c0_6 = arith.constant 0 : index
    %c0_7 = arith.constant 0 : index
    %c0_8 = arith.constant 0 : index
    %17 = vector.load %arg2[%c0_6, %c0_7, %c0_8] : memref<2x8x128xf32, #tpu.memory_space<vmem>>, vector<1x8x128xf32>
    %18 = vector.shape_cast %17 : vector<1x8x128xf32> to vector<8x128xf32>
    %19 = vector.shape_cast %16 : vector<8x128xf32> to vector<1x8x128xf32>
    tpu.vector_store %arg2[%c0_6, %c0_7, %c0_8], %19 {strides = array<i32>} : memref<2x8x128xf32, #tpu.memory_space<vmem>>, vector<1x8x128xf32>,
    %cst_9 = arith.constant 0.000000e+00 : f32
    %20 = vector.broadcast %cst_9 : f32 to vector<8x128xf32>
    %21 = arith.select %15, %3, %20 : vector<8x128xi1>, vector<8x128xf32>
    %c1_10 = arith.constant 1 : index
    %c0_11 = arith.constant 0 : index
    %c0_12 = arith.constant 0 : index
    %22 = vector.load %arg2[%c1_10, %c0_11, %c0_12] : memref<2x8x128xf32, #tpu.memory_space<vmem>>, vector<1x8x128xf32>
    %23 = vector.shape_cast %22 : vector<1x8x128xf32> to vector<8x128xf32>
    %24 = vector.shape_cast %21 : vector<8x128xf32> to vector<1x8x128xf32>
    tpu.vector_store %arg2[%c1_10, %c0_11, %c0_12], %24 {strides = array<i32>} : memref<2x8x128xf32, #tpu.memory_space<vmem>>, vector<1x8x128xf32>,
    return
  }
  func.func @transform_0(%arg0: i32) -> (i32, i32, i32) {
    %c0_i32 = arith.constant 0 : i32
    %c0_i32_0 = arith.constant 0 : i32
    %c0_i32_1 = arith.constant 0 : i32
    return %c0_i32, %arg0, %c0_i32_0 : i32, i32, i32
  }
  func.func @transform_1(%arg0: i32) -> (i32, i32, i32) {
    %c0_i32 = arith.constant 0 : i32
    %c0_i32_0 = arith.constant 0 : i32
    %c0_i32_1 = arith.constant 0 : i32
    return %c0_i32, %arg0, %c0_i32_0 : i32, i32, i32
  }
}

</mosaic_0001>

<bundles_post_ra>
// kernel: squeeze.3
= control target key start
LH: loop header
LB: loop body
LE: loop exit
PB: predicated region body
PF: predicated region fallthrough
CT: control target
= control target key end

     0   :  { %vm4_vm0 = vcmask 130048   ;;  %s184_s10 = smov 112   ;;  %s251_s0 = inlined_call_operand.vmem [shape: f32[1,16,128], index: 0, kind: input, shape index: {}]   ;;  %s252_s1 = inlined_call_operand.hbm [shape: f32[2,4,16,16], index: 1, kind: output, shape index: {}]  }
   0x1   :  { %v31_v0 = vld [vmem:[%s251_s0] sm:$0xff]   ;;  %v145_v1 = vld [vmem:[%s251_s0 + $0x8] sm:$0xff]   ;;  %s183_s0 = smov 96  }
   0x2   :  { %32 = vrot.lane.b32.xlu1 %v31_v0, %s183_s0  ;;  %15 = vrot.lane.b32.xlu0 %v31_v0, %s184_s10 }
   0x3   :  { %2 = vsyncpa [#allocation1], 0  ;;  %5 = vst.msk [vmem:[#allocation0] ss:$8 sm:$0xf] %vm4_vm0, %v31_v0   ;;  %s185_s11 = smov 80  }
   0x4   :  { %6 = vst.msk [vmem:[#allocation0] ss:$8 sm:$0xf0] %vm4_vm0, %v31_v0   ;;  %11 = vst.msk [vmem:[#allocation0 + $0x40] ss:$8 sm:$0xf] %vm4_vm0, %v145_v1  }
   0x5   :  { %13 = vst.msk [vmem:[#allocation0 + $0x40] ss:$8 sm:$0xf0] %vm4_vm0, %v145_v1   ;;  %s186_s12 = smov 64   ;;  %s187_s13 = smov 48  }
   0x6   :  { %41 = vrot.lane.b32.xlu1 %v145_v1, %s183_s0  ;;  %24 = vrot.lane.b32.xlu0 %v145_v1, %s184_s10  ;;  %s188_s14 = smov 32   ;;  %s189_s15 = smov 16  }
   0x7   :  { %s190_s16 = smov [#allocation0]  }
   0x8   :  { %s137_s17 = sshll.u32 %s190_s16, 4  ;;  %s138_s17 = int_to_ptr.vmem [resolvable:$true] %s137_s17 }
   0x9   :  { %s159_s18 = scalar_lea.vmem %s138_s17, 2048  ;;  %p164_p1 = scmp.lt.s32.totalorder %s138_s17, %s138_s17 }
   0xa   :  { %58 = vrot.lane.b32.xlu1 %v145_v1, %s185_s11  ;;  %49 = vrot.lane.b32.xlu0 %v31_v0, %s185_s11  ;;  %p160_p0 = scmp.ne.s32.totalorder %s138_s17, %s159_s18  ;;  %p165_p2 = scmp.lt.s32.totalorder %s159_s18, %s159_s18 }
   0xc   :  { %p166_p3 = por %p165_p2, %p164_p1 }
   0xe   :  { %75 = vrot.lane.b32.xlu1 %v145_v1, %s186_s12  ;;  %66 = vrot.lane.b32.xlu0 %v31_v0, %s186_s12  ;;  %p167_p4 = pnand %p166_p3, %p160_p0 }
  0x12   :  { %92 = vrot.lane.b32.xlu1 %v145_v1, %s187_s13  ;;  %83 = vrot.lane.b32.xlu0 %v31_v0, %s187_s13 }
  0x16   :  { %109 = vrot.lane.b32.xlu1 %v145_v1, %s188_s14  ;;  %100 = vrot.lane.b32.xlu0 %v31_v0, %s188_s14 }
  0x1a   :  { %126 = vrot.lane.b32.xlu1 %v145_v1, %s189_s15  ;;  %117 = vrot.lane.b32.xlu0 %v31_v0, %s189_s15 }
  0x74   :  { %v33_v2 = vpop.permute.xlu1 %32   ;;  %v16_v3 = vpop.permute.xlu0 %15  }
  0x75   :  { %36 = vst.msk [vmem:[#allocation0 + $0x2] ss:$8 sm:$0xf] %vm4_vm0, %v33_v2   ;;  %38 = vst.msk [vmem:[#allocation0 + $0x2] ss:$8 sm:$0xf0] %vm4_vm0, %v33_v2  }
  0x76   :  { %19 = vst.msk [vmem:[#allocation0 + $0x1] ss:$8 sm:$0xf] %vm4_vm0, %v16_v3   ;;  %21 = vst.msk [vmem:[#allocation0 + $0x1] ss:$8 sm:$0xf0] %vm4_vm0, %v16_v3  }
  0x78   :  { %v42_v4 = vpop.permute.xlu1 %41   ;;  %v25_v5 = vpop.permute.xlu0 %24  }
  0x79   :  { %45 = vst.msk [vmem:[#allocation0 + $0x42] ss:$8 sm:$0xf] %vm4_vm0, %v42_v4   ;;  %47 = vst.msk [vmem:[#allocation0 + $0x42] ss:$8 sm:$0xf0] %vm4_vm0, %v42_v4  }
  0x7a   :  { %28 = vst.msk [vmem:[#allocation0 + $0x41] ss:$8 sm:$0xf] %vm4_vm0, %v25_v5   ;;  %30 = vst.msk [vmem:[#allocation0 + $0x41] ss:$8 sm:$0xf0] %vm4_vm0, %v25_v5  }
  0x7c   :  { %v59_v6 = vpop.permute.xlu1 %58   ;;  %v50_v7 = vpop.permute.xlu0 %49  }
  0x7d   :  { %62 = vst.msk [vmem:[#allocation0 + $0x43] ss:$8 sm:$0xf] %vm4_vm0, %v59_v6   ;;  %64 = vst.msk [vmem:[#allocation0 + $0x43] ss:$8 sm:$0xf0] %vm4_vm0, %v59_v6  }
  0x7e   :  { %53 = vst.msk [vmem:[#allocation0 + $0x3] ss:$8 sm:$0xf] %vm4_vm0, %v50_v7   ;;  %55 = vst.msk [vmem:[#allocation0 + $0x3] ss:$8 sm:$0xf0] %vm4_vm0, %v50_v7  }
  0x80   :  { %v76_v8 = vpop.permute.xlu1 %75   ;;  %v67_v9 = vpop.permute.xlu0 %66  }
  0x81   :  { %79 = vst.msk [vmem:[#allocation0 + $0x44] ss:$8 sm:$0xf] %vm4_vm0, %v76_v8   ;;  %81 = vst.msk [vmem:[#allocation0 + $0x44] ss:$8 sm:$0xf0] %vm4_vm0, %v76_v8  }
  0x82   :  { %70 = vst.msk [vmem:[#allocation0 + $0x4] ss:$8 sm:$0xf] %vm4_vm0, %v67_v9   ;;  %72 = vst.msk [vmem:[#allocation0 + $0x4] ss:$8 sm:$0xf0] %vm4_vm0, %v67_v9  }
  0x84   :  { %v93_v10 = vpop.permute.xlu1 %92   ;;  %v84_v11 = vpop.permute.xlu0 %83  }
  0x85   :  { %96 = vst.msk [vmem:[#allocation0 + $0x45] ss:$8 sm:$0xf] %vm4_vm0, %v93_v10   ;;  %98 = vst.msk [vmem:[#allocation0 + $0x45] ss:$8 sm:$0xf0] %vm4_vm0, %v93_v10  }
  0x86   :  { %87 = vst.msk [vmem:[#allocation0 + $0x5] ss:$8 sm:$0xf] %vm4_vm0, %v84_v11   ;;  %89 = vst.msk [vmem:[#allocation0 + $0x5] ss:$8 sm:$0xf0] %vm4_vm0, %v84_v11  }
  0x88   :  { %v110_v12 = vpop.permute.xlu1 %109   ;;  %v101_v13 = vpop.permute.xlu0 %100  }
  0x89   :  { %113 = vst.msk [vmem:[#allocation0 + $0x46] ss:$8 sm:$0xf] %vm4_vm0, %v110_v12   ;;  %115 = vst.msk [vmem:[#allocation0 + $0x46] ss:$8 sm:$0xf0] %vm4_vm0, %v110_v12  }
  0x8a   :  { %104 = vst.msk [vmem:[#allocation0 + $0x6] ss:$8 sm:$0xf] %vm4_vm0, %v101_v13   ;;  %106 = vst.msk [vmem:[#allocation0 + $0x6] ss:$8 sm:$0xf0] %vm4_vm0, %v101_v13  }
  0x8c   :  { %v127_v14 = vpop.permute.xlu1 %126   ;;  %v118_v15 = vpop.permute.xlu0 %117  }
  0x8d   :  { %130 = vst.msk [vmem:[#allocation0 + $0x47] ss:$8 sm:$0xf] %vm4_vm0, %v127_v14   ;;  %132 = vst.msk [vmem:[#allocation0 + $0x47] ss:$8 sm:$0xf0] %vm4_vm0, %v127_v14  }
  0x8e   :  { %121 = vst.msk [vmem:[#allocation0 + $0x7] ss:$8 sm:$0xf] %vm4_vm0, %v118_v15   ;;  %123 = vst.msk [vmem:[#allocation0 + $0x7] ss:$8 sm:$0xf0] %vm4_vm0, %v118_v15  }
  0x8f   :  { %170 = shalt.err (!%p167_p4)
}
  0x90   :  { %s171_s21 = scalar_lea.hbm %s252_s1, 2048 }
  0x91   :  { %p172_p5 = scmp.ne.s32.totalorder %s252_s1, %s171_s21  ;;  %p175_p6 = scmp.lt.u32.totalorder %s171_s21, %s252_s1 }
  0x93   :  { %p177_p7 = pnand %p175_p6, %p172_p5 }
  0x95   :  { %180 = shalt.err (!%p177_p7)
}
  0x96   :  { %140 = dma.vmem_to_hbm [thread:$0]  %s138_s17, 2048, %s252_s1, [#allocation1]  }
  0x97   :  { %181 = dma.done.wait [#allocation1], 2048  }
  0x98   :  { %182 = vsyncadd [#allocation1], 4294965248 }
  0x99   :  { %142 = vsyncpa [#allocation1], 1 }

// kernel: phase_amplitude_relu_planes.1
= control target key start
LH: loop header
LB: loop body
LE: loop exit
PB: predicated region body
PF: predicated region fallthrough
CT: control target
= control target key end

     0   :  { %s348_s6 = smov 0   ;;  %s350_s7 = smov 0   ;;  %s408_s0 = inlined_call_operand.vmem [shape: f32[2,16,128], index: 0, kind: input, shape index: {}]   ;;  %s409_s1 = inlined_call_operand.vmem [shape: f32[2,16,128], index: 1, kind: output, shape index: {}]  }
   0x1   :  { %s352_s8 = smov 0  }
   0x2 LB: > { %s273_s9 = sadd.s32 4294967295, %s336_s8   ;;  %s365_s10 = sadd.s32 1, %s336_s8   ;;  %s336_s8 = sphi %s352_s8, %s413_s8   ;;  %s332_s7 = sphi %s350_s7, %s412_s7   ;;  %s328_s6 = sphi %s348_s6, %s411_s6  }
   0x3   : > { %s15_s11 = ssub.s32 %s336_s8, %s365_s10  ;;  %s18_s12 = sadd.s32 1, %s332_s7 }
   0x4   : > { %p16_p0 = scmp.eq.s32.totalorder %s15_s11, 0  ;;  %p25_p1 = scmp.ne.s32.totalorder %s332_s7, %s328_s6 }
   0x5   : > { %p26_p2 = scmp.eq.s32.totalorder %s336_s8, 0  ;;  %p55_p3 = scmp.eq.s32.totalorder %s273_s9, 1 }
   0x6   : > { %s376_s13 = scalar_select %p16_p0, %s332_s7, %s18_s12  }
   0x7   : > { %p27_p4 = por %p26_p2, %p25_p1  ;;  %p378_p5 = por %p55_p3, %p25_p1 }
   0x8   : > { %p276_p6 = scmp.ge.s32.totalorder %s336_s8, 2 }
   0xa   : > { %77 = sbr.rel (%p276_p6) target bundleno = 24 (0x18), region = 16 }
  0x11   : > { %80 = sbr.rel (!%p27_p4) target bundleno = 24 (0x18), region = 20  ;;  %s82_s15 = sand.u32 (%p27_p4), 1, %s332_s7  }
  0x12   : > { %s278_s16 = sshll.u32 (%p27_p4), %s336_s8, 3  ;;  %s277_s17 = sshll.u32 (%p27_p4), %s82_s15, 4 }
  0x13   : > { %s86_s20 = scalar_lea.vmem (%p27_p4), %s408_s0, %s278_s16  ;;  %s84_s21 = scalar_lea.vmem (%p27_p4), [#allocation2], %s277_s17 }
  0x14   : > { %v116_v0 = vld [vmem:[%s86_s20] sm:$0xff] (%p27_p4)  ;;  %v118_v1 = vld [vmem:[%s86_s20 + $0x10] sm:$0xff] (%p27_p4) }
  0x15   : > { %117 = vst [vmem:[%s84_s21] sm:$0xff] (%p27_p4), %v116_v0  ;;  %119 = vst [vmem:[%s84_s21 + $0x8] sm:$0xff] (%p27_p4), %v118_v1 }
  0x18 PF: > { %p279_p7 = scmp.ge.s32.totalorder %s336_s8, 1  ;;  %p124_p8 = scmp.lt.s32.totalorder %s336_s8, 3 }
  0x1a   : > { %p125_p9 = pnand %p279_p7, %p124_p8 }
  0x1b   : > { %s131_s22 = sand.u32 (!%p125_p9), 1, %s328_s6  }
  0x1c   : > { %128 = sbr.rel (%p125_p9) target bundleno = 60 (0x3c), region = 58  ;;  %s280_s23 = sshll.u32 (!%p125_p9), %s131_s22, 4 }
  0x1d   : > { %s133_s24 = scalar_lea.vmem (!%p125_p9), [#allocation2], %s280_s23  ;;  %s148_s25 = scalar_lea.vmem (!%p125_p9), [#allocation3], %s280_s23 }
  0x1e   : > { %v149_v2 = vld [vmem:[%s133_s24] sm:$0xff] (!%p125_p9)  ;;  %v282_v3 = vld [vmem:[%s133_s24 + $0x8] sm:$0xff] (!%p125_p9) }
  0x1f   : > { %v152_v4 = vmul.f32 (!%p125_p9), %v149_v2, %v149_v2  ;;  %v153_v5 = vmul.f32 (!%p125_p9), %v282_v3, %v282_v3  ;;  %vm162_vm0 = vcmp.gt.f32.partialorder (!%p125_p9), %v282_v3, 0.0  ;;  %vm163_vm1 = vcmp.eq.f32.partialorder (!%p125_p9), %v282_v3, 0.0 }
  0x20   : > { %vm164_vm2 = vcmp.lt.f32.partialorder (!%p125_p9), %v149_v2, 0.0 }
  0x21   : > { %v154_v6 = vadd.f32 (!%p125_p9), %v153_v5, %v152_v4  ;;  %vm165_vm3 = vmand (!%p125_p9), %vm163_vm1, %vm164_vm2 }
  0x22   : > { %vm166_vm4 = vmor (!%p125_p9), %vm162_vm0, %vm165_vm3 }
  0x23   : > { %312 = vrsqrt.f32 %v154_v6  ;;  %v169_v7 = vsel %vm166_vm4, %v282_v3, 0.0  ;;  %vm157_vm5 = vcmp.eq.f32.partialorder %v154_v6, inf  ;;  %v160_v9 = vand.u32 2147483648, %v154_v6  ;;  %s285_s26 = sshll.u32 (%p378_p5), %s273_s9, 3 }
  0x24   : > { %283 = vst [vmem:[%s148_s25 + $0x8] sm:$0xff] %v169_v7  ;;  %vm159_vm6 = vcmp.eq.f32.partialorder %v154_v6, 0.0  ;;  %s180_s29 = scalar_lea.vmem (%p378_p5), %s409_s1, %s285_s26 }
  0x2b   : > { %v212_v15 = vld [vmem:[%s148_s25 + $0x8] sm:$0xff] (%p378_p5) }
  0x2c   : > { %213 = vst [vmem:[%s180_s29 + $0x10] sm:$0xff] (%p378_p5), %v212_v15 }
  0x2d   : > { %v313_v8 = vpop.eup %312  ;;  %178 = sbr.rel (!%p378_p5) target bundleno = 60 (0x3c), region = 66 }
  0x2e   : > { %v156_v10 = vmul.f32 %v313_v8, %v154_v6 }
  0x30   : > { %v158_v11 = vsel %vm157_vm5, %v154_v6, %v156_v10 }
  0x31   : > { %v161_v12 = vsel %vm159_vm6, %v160_v9, %v158_v11 }
  0x32   : > { %v167_v13 = vsel %vm166_vm4, %v149_v2, %v161_v12 }
  0x33   : > { %168 = vst [vmem:[%s148_s25] sm:$0xff] %v167_v13 }
  0x3a   : > { %v210_v14 = vld [vmem:[%s148_s25] sm:$0xff] }
  0x3b   : > { %211 = vst [vmem:[%s180_s29] sm:$0xff] %v210_v14 }
  0x3c PF: > { %p8_p10 = scmp.ge.s32.totalorder %s365_s10, 4   ;;  %s411_s6 = smov %s332_s7 }
  0x3d   : > { %s412_s7 = smov %s376_s13  ;;  %s413_s8 = smov %s365_s10 }
  0x3e   :  { %10 = sbr.rel (!%p8_p10) target bundleno = 2 (0x2), region = 137 }

</bundles_post_ra>
